<compile_context>
chip_gen: v7x
topology: tpu7x:2x2x1
jax: 0.10.0
libtpu: 0.0.40
codegen_flags: <defaults>
</compile_context>

<pallas_src>
import functools

import jax
import jax.numpy as jnp
from jax import lax
from jax.experimental import pallas as pl
from jax.experimental.pallas import tpu as pltpu


def _rnn_kernel(x_ref, wxh_ref, whh_ref, bh_ref, wfc_ref, bfc_ref,
                y_ref, h_ref, xw_ref, *, seq_len, time_tile, needs_mask,
                unroll):
    # x_ref:   (Tc, Bb, Ip)  streamed time tile (matmul dtype)
    # wxh_ref: (Ip, Hp)      whh_ref: (Hp, Hp)   (matmul dtype)
    # bh_ref:  (1, Hp) f32   wfc_ref: (Hp, Op) f32   bfc_ref: (1, Op) f32
    # y_ref:   (Bb, Op) f32  output (resident across the time grid axis)
    # h_ref:   (Bb, Hp) f32  VMEM scratch — hidden state, persists across grid
    # xw_ref:  (Tc, Bb, Hp)  VMEM scratch — hoisted input projection (+ b_h)
    t_blk = pl.program_id(1)
    Tc, Bb, Ip = x_ref.shape
    Hp = whh_ref.shape[0]
    cdt = whh_ref.dtype  # MXU operand dtype (f32 or bf16)

    @pl.when(t_blk == 0)
    def _init():
        h_ref[...] = jnp.zeros_like(h_ref)

    # Hoisted (time-parallel) input projection with b_h folded in:
    # a single tall matmul with M = Tc*Bb, fully overlapped / off the serial
    # chain. f32 accumulation regardless of operand dtype.
    xw = jnp.dot(
        x_ref[...].reshape(Tc * Bb, Ip), wxh_ref[...],
        preferred_element_type=jnp.float32,
    ).reshape(Tc, Bb, Hp)
    xw_ref[...] = xw + bh_ref[...]

    w_hh = whh_ref[...]          # hoisted out of the loop

    def step(k, h):
        pre = xw_ref[k] + jnp.dot(h.astype(cdt), w_hh,
                                  preferred_element_type=jnp.float32)
        h_new = jnp.tanh(pre)    # f32 tanh -> EUP slot
        if needs_mask:
            t_glob = t_blk * time_tile + k
            h_new = jnp.where(t_glob < seq_len, h_new, h)
        return h_new

    h_ref[...] = lax.fori_loop(0, Tc, step, h_ref[...], unroll=unroll)

    @pl.when(t_blk == pl.num_programs(1) - 1)
    def _finalize():
        y = jnp.dot(h_ref[...], wfc_ref[...],
                    preferred_element_type=jnp.float32) + bfc_ref[...]
        y_ref[...] = y.astype(y_ref.dtype)


def _round_up(n, m):
    return ((n + m - 1) // m) * m


def _vmem_limit_bytes():
    # Per-generation scoped-VMEM budget: ~0.75 * physical capacity, clamped.
    # (v5e/v6e: 128 MiB -> ~96 MiB; v7x: 64 MiB -> 48 MiB; fallback 48 MiB.)
    cap = 64 * 1024 * 1024
    try:
        info = pltpu.get_tpu_info()
        cap = int(getattr(info, "vmem_capacity_bytes", cap) or cap)
    except Exception:
        pass
    return max(32 * 1024 * 1024, min((cap * 3) // 4, 100 * 1024 * 1024))


def rnn_forward(x_btI, w_xh, w_hh, b_h, w_fc, b_fc, *,
                matmul_dtype=jnp.float32, time_tile_cap=64,
                num_batch_blocks=1):
    """x_btI: (B, T, I) float32. Returns (B, O) float32."""
    B, T, I = x_btI.shape
    H = w_hh.shape[0]
    O = w_fc.shape[0]              # torch Linear weight is (O, H)
    f32 = jnp.float32
    wbytes = jnp.dtype(matmul_dtype).itemsize

    # bf16 vreg tile packs 16 sublanes; f32 packs 8.
    sub = 16 if matmul_dtype == jnp.bfloat16 else 8
    nb = max(1, int(num_batch_blocks))        # >1 only useful on v7x (2 TCs)
    Bp = _round_up(max(B, sub * nb), sub * nb)
    Bb = Bp // nb                             # batch rows per grid block
    Ip = _round_up(I, 128)                    # lane-dense feature dim
    Hp = _round_up(H, 128)                    # lane-dense hidden dim
    Op = _round_up(O, 128)                    # lane-dense output dim

    vmem_limit = _vmem_limit_bytes()

    def vmem_estimate(tc):
        # Counts the compiler's default double-buffering of every input block
        # (even constant-index weights) and of the output block.
        return (2 * tc * Bb * Ip * wbytes                 # x tile
                + 2 * (Ip * Hp + Hp * Hp) * wbytes        # W_xh, W_hh
                + 2 * (Hp + Hp * Op + Op + Bb * Op) * 4   # b_h, W_fc, b_fc, y
                + (Bb * Hp + tc * Bb * Hp) * 4)           # scratch: h, xw

    # Fixed (large) time tile + in-kernel remainder masking; shrink only if
    # the VMEM budget demands it.
    Tc = max(1, min(T, time_tile_cap))
    while Tc > 8 and vmem_estimate(Tc) > vmem_limit:
        Tc = max(8, Tc // 2)
    assert vmem_estimate(Tc) <= vmem_limit, (
        f"VMEM estimate {vmem_estimate(Tc)} exceeds budget {vmem_limit}; "
        f"reduce H or use matmul_dtype=bfloat16")

    nt = pl.cdiv(T, Tc)
    Tp = nt * Tc
    needs_mask = (T % Tc) != 0
    unroll = True if Hp <= 256 else 8  # avoid vreg spills at large Hp

    # Time-major layout + zero padding. Padded hidden/feature lanes stay
    # exactly zero through tanh; padded batch rows are sliced off; padded
    # timesteps are masked out inside the kernel (never zero-pad T without
    # masking: tanh(h@W_hh + b_h) != h).
    x_tbI = jnp.transpose(x_btI.astype(f32), (1, 0, 2))            # (T, B, I)
    x_p = jnp.zeros((Tp, Bp, Ip), matmul_dtype).at[:T, :B, :I].set(
        x_tbI.astype(matmul_dtype))
    wxh_p = jnp.zeros((Ip, Hp), matmul_dtype).at[:I, :H].set(
        w_xh.astype(matmul_dtype))
    whh_p = jnp.zeros((Hp, Hp), matmul_dtype).at[:H, :H].set(
        w_hh.astype(matmul_dtype))
    bh_p = jnp.zeros((1, Hp), f32).at[0, :H].set(b_h.astype(f32))
    wfc_p = jnp.zeros((Hp, Op), f32).at[:H, :O].set(
        jnp.transpose(w_fc.astype(f32), (1, 0)))
    bfc_p = jnp.zeros((1, Op), f32).at[0, :O].set(b_fc.astype(f32))

    cost = pl.CostEstimate(
        flops=2 * T * B * I * H + 2 * T * B * H * H + 2 * B * H * O,
        transcendentals=T * B * H,
        bytes_accessed=(wbytes * (Tp * Bp * Ip + Ip * Hp + Hp * Hp)
                        + 4 * (Hp + Hp * Op + Op + Bp * Op)),
    )

    kernel = functools.partial(_rnn_kernel, seq_len=T, time_tile=Tc,
                               needs_mask=needs_mask, unroll=unroll)

    y_p = pl.pallas_call(
        kernel,
        out_shape=jax.ShapeDtypeStruct((Bp, Op), f32),
        grid_spec=pltpu.PrefetchScalarGridSpec(
            num_scalar_prefetch=0,
            grid=(Bp // Bb, nt),
            in_specs=[
                pl.BlockSpec((Tc, Bb, Ip), lambda b, t: (t, b, 0)),  # x
                pl.BlockSpec((Ip, Hp), lambda b, t: (0, 0)),         # W_xh
                pl.BlockSpec((Hp, Hp), lambda b, t: (0, 0)),         # W_hh
                pl.BlockSpec((1, Hp), lambda b, t: (0, 0)),          # b_h
                pl.BlockSpec((Hp, Op), lambda b, t: (0, 0)),         # W_fc^T
                pl.BlockSpec((1, Op), lambda b, t: (0, 0)),          # b_fc
            ],
            out_specs=pl.BlockSpec((Bb, Op), lambda b, t: (b, 0)),
            scratch_shapes=[
                pltpu.VMEM((Bb, Hp), f32),        # hidden state carry
                pltpu.VMEM((Tc, Bb, Hp), f32),    # hoisted x @ W_xh + b_h
            ],
        ),
        compiler_params=pltpu.CompilerParams(
            dimension_semantics=("parallel", "arbitrary"),
            vmem_limit_bytes=vmem_limit,
        ),
        cost_estimate=cost,
    )(x_p, wxh_p, whh_p, bh_p, wfc_p, bfc_p)

    return y_p[:B, :O]


def rnn_reference(x_btI, w_xh, w_hh, b_h, w_fc, b_fc):
    B, T, I = x_btI.shape
    H = w_hh.shape[0]
    h = jnp.zeros((B, H), jnp.float32)
    for t in range(T):
        h = jnp.tanh(x_btI[:, t, :] @ w_xh + h @ w_hh + b_h)
    return h @ w_fc.T + b_fc


if __name__ == "__main__":
    # Small shapes consistent with the module's forward: (B, T, I), hidden H, out O.
    B, T, I, H, O = 2, 8, 4, 32, 8

    key = jax.random.PRNGKey(0)
    k_x, k_wxh, k_whh, k_why, k_wfc, k_bfc = jax.random.split(key, 6)

    x = jax.random.normal(k_x, (B, T, I), dtype=jnp.float32)

    # Parameters mirroring the module's __init__ shapes.
    W_xh = jax.random.normal(k_wxh, (I, H), dtype=jnp.float32)
    W_hh = jax.random.normal(k_whh, (H, H), dtype=jnp.float32)
    b_h = jnp.zeros((H,), dtype=jnp.float32)
    # W_hy / b_y: declared in the module but unused in forward().
    W_hy = jax.random.normal(k_why, (H, O), dtype=jnp.float32)  # unused
    b_y = jnp.zeros((O,), dtype=jnp.float32)                    # unused
    # self.fc = Linear(H, O): weight (O, H), bias (O,)
    W_fc = jax.random.normal(k_wfc, (O, H), dtype=jnp.float32) * 0.1
    b_fc = jax.random.normal(k_bfc, (O,), dtype=jnp.float32) * 0.1

    # f32 MXU-operand path: exact parity with the PyTorch forward.
    y = rnn_forward(x, W_xh, W_hh, b_h, W_fc, b_fc)
    y = jax.block_until_ready(y)

    y_ref = rnn_reference(x, W_xh, W_hh, b_h, W_fc, b_fc)
    assert y.shape == (B, O)
    assert jnp.allclose(y, y_ref, atol=1e-4, rtol=1e-4)

    # bf16 MXU-operand path (the main perf lever from the review): exercised
    # for compile/run coverage. bf16 operands in a chaotic randn-weight RNN
    # do not satisfy 1e-4 parity, so only sanity-check it.
    y_bf16 = jax.block_until_ready(
        rnn_forward(x, W_xh, W_hh, b_h, W_fc, b_fc,
                    matmul_dtype=jnp.bfloat16))
    assert y_bf16.shape == (B, O)
    assert bool(jnp.all(jnp.isfinite(y_bf16)))

    print("KERNEL_OK")
</pallas_src>

<mosaic_0001>
module attributes {stable_mosaic.version = 11 : i64} {
  func.func @_rnn_kernel(%arg0: i32, %arg1: i32, %arg2: memref<8x8x128xf32, #tpu.memory_space<vmem>>, %arg3: memref<128x128xf32, #tpu.memory_space<vmem>>, %arg4: memref<128x128xf32, #tpu.memory_space<vmem>>, %arg5: memref<1x128xf32, #tpu.memory_space<vmem>>, %arg6: memref<128x128xf32, #tpu.memory_space<vmem>>, %arg7: memref<1x128xf32, #tpu.memory_space<vmem>>, %arg8: memref<8x128xf32, #tpu.memory_space<vmem>>, %arg9: memref<8x128xf32, #tpu.memory_space<vmem>>, %arg10: memref<8x8x128xf32, #tpu.memory_space<vmem>>) attributes {dimension_semantics = [#tpu.dimension_semantics<parallel>, #tpu.dimension_semantics<arbitrary>], iteration_bounds = array<i64: 1, 1>, scalar_prefetch = 0 : i64, scratch_operands = 2 : i64, tpu.core_type = #tpu.core_type<tc>, window_params = [{transform_indices = @transform_0, window_bounds = array<i64: 8, 8, 128>}, {pipeline_mode = #tpu.pipeline_mode<synchronous>, transform_indices = @transform_1, window_bounds = array<i64: 128, 128>}, {pipeline_mode = #tpu.pipeline_mode<synchronous>, transform_indices = @transform_2, window_bounds = array<i64: 128, 128>}, {pipeline_mode = #tpu.pipeline_mode<synchronous>, transform_indices = @transform_3, window_bounds = array<i64: 1, 128>}, {pipeline_mode = #tpu.pipeline_mode<synchronous>, transform_indices = @transform_4, window_bounds = array<i64: 128, 128>}, {pipeline_mode = #tpu.pipeline_mode<synchronous>, transform_indices = @transform_5, window_bounds = array<i64: 1, 128>}, {transform_indices = @transform_6, window_bounds = array<i64: 8, 128>}]} {
    %c0_i32 = arith.constant 0 : i32
    %0 = arith.cmpi eq, %arg1, %c0_i32 : i32
    %1 = arith.extui %0 : i1 to i32
    %c0_i32_0 = arith.constant 0 : i32
    %2 = arith.cmpi ne, %1, %c0_i32_0 : i32
    scf.if %2 {
      %cst_43 = arith.constant 0.000000e+00 : f32
      %67 = vector.broadcast %cst_43 : f32 to vector<8x128xf32>
      %c0_44 = arith.constant 0 : index
      %c0_45 = arith.constant 0 : index
      %68 = vector.load %arg9[%c0_44, %c0_45] : memref<8x128xf32, #tpu.memory_space<vmem>>, vector<8x128xf32>
      tpu.vector_store %arg9[%c0_44, %c0_45], %67 {strides = array<i32>} : memref<8x128xf32, #tpu.memory_space<vmem>>, vector<8x128xf32>,
    } else {
    }
    %c0 = arith.constant 0 : index
    %c0_1 = arith.constant 0 : index
    %c0_2 = arith.constant 0 : index
    %3 = vector.load %arg2[%c0, %c0_1, %c0_2] : memref<8x8x128xf32, #tpu.memory_space<vmem>>, vector<8x8x128xf32>
    %4 = vector.shape_cast %3 : vector<8x8x128xf32> to vector<64x128xf32>
    %c0_3 = arith.constant 0 : index
    %c0_4 = arith.constant 0 : index
    %5 = vector.load %arg3[%c0_3, %c0_4] : memref<128x128xf32, #tpu.memory_space<vmem>>, vector<128x128xf32>
    %cst = arith.constant dense<0.000000e+00> : vector<64x128xf32>
    %6 = tpu.matmul %4, %5, %cst {dimension_numbers = #tpu.dot_dimension_numbers<[1], [0], [0], [1], [0, 0, 1, 1], [], []>} : vector<64x128xf32>, vector<128x128xf32>, vector<64x128xf32> -> vector<64x128xf32>
    %7 = vector.shape_cast %6 : vector<64x128xf32> to vector<8x8x128xf32>
    %c0_5 = arith.constant 0 : index
    %c0_6 = arith.constant 0 : index
    %8 = vector.load %arg5[%c0_5, %c0_6] : memref<1x128xf32, #tpu.memory_space<vmem>>, vector<1x128xf32>
    %9 = vector.shape_cast %8 : vector<1x128xf32> to vector<1x1x128xf32>
    %10 = vector.broadcast %9 : vector<1x1x128xf32> to vector<8x8x128xf32>
    %11 = arith.addf %7, %10 : vector<8x8x128xf32>
    %c0_7 = arith.constant 0 : index
    %c0_8 = arith.constant 0 : index
    %c0_9 = arith.constant 0 : index
    %12 = vector.load %arg10[%c0_7, %c0_8, %c0_9] : memref<8x8x128xf32, #tpu.memory_space<vmem>>, vector<8x8x128xf32>
    tpu.vector_store %arg10[%c0_7, %c0_8, %c0_9], %11 {strides = array<i32>} : memref<8x8x128xf32, #tpu.memory_space<vmem>>, vector<8x8x128xf32>,
    %c0_10 = arith.constant 0 : index
    %c0_11 = arith.constant 0 : index
    %13 = vector.load %arg4[%c0_10, %c0_11] : memref<128x128xf32, #tpu.memory_space<vmem>>, vector<128x128xf32>
    %c0_12 = arith.constant 0 : index
    %c0_13 = arith.constant 0 : index
    %14 = vector.load %arg9[%c0_12, %c0_13] : memref<8x128xf32, #tpu.memory_space<vmem>>, vector<8x128xf32>
    %c0_i32_14 = arith.constant 0 : i32
    %15 = arith.index_cast %c0_i32_14 : i32 to index
    %c0_15 = arith.constant 0 : index
    %c0_16 = arith.constant 0 : index
    %16 = vector.load %arg10[%15, %c0_15, %c0_16] : memref<8x8x128xf32, #tpu.memory_space<vmem>>, vector<1x8x128xf32>
    %17 = vector.shape_cast %16 : vector<1x8x128xf32> to vector<8x128xf32>
    %cst_17 = arith.constant dense<0.000000e+00> : vector<8x128xf32>
    %18 = tpu.matmul %14, %13, %cst_17 {dimension_numbers = #tpu.dot_dimension_numbers<[1], [0], [0], [1], [0, 0, 1, 1], [], []>} : vector<8x128xf32>, vector<128x128xf32>, vector<8x128xf32> -> vector<8x128xf32>
    %19 = arith.addf %17, %18 : vector<8x128xf32>
    %20 = math.tanh %19 : vector<8x128xf32>
    %c1_i32 = arith.constant 1 : i32
    %21 = arith.index_cast %c1_i32 : i32 to index
    %c0_18 = arith.constant 0 : index
    %c0_19 = arith.constant 0 : index
    %22 = vector.load %arg10[%21, %c0_18, %c0_19] : memref<8x8x128xf32, #tpu.memory_space<vmem>>, vector<1x8x128xf32>
    %23 = vector.shape_cast %22 : vector<1x8x128xf32> to vector<8x128xf32>
    %cst_20 = arith.constant dense<0.000000e+00> : vector<8x128xf32>
    %24 = tpu.matmul %20, %13, %cst_20 {dimension_numbers = #tpu.dot_dimension_numbers<[1], [0], [0], [1], [0, 0, 1, 1], [], []>} : vector<8x128xf32>, vector<128x128xf32>, vector<8x128xf32> -> vector<8x128xf32>
    %25 = arith.addf %23, %24 : vector<8x128xf32>
    %26 = math.tanh %25 : vector<8x128xf32>
    %c2_i32 = arith.constant 2 : i32
    %27 = arith.index_cast %c2_i32 : i32 to index
    %c0_21 = arith.constant 0 : index
    %c0_22 = arith.constant 0 : index
    %28 = vector.load %arg10[%27, %c0_21, %c0_22] : memref<8x8x128xf32, #tpu.memory_space<vmem>>, vector<1x8x128xf32>
    %29 = vector.shape_cast %28 : vector<1x8x128xf32> to vector<8x128xf32>
    %cst_23 = arith.constant dense<0.000000e+00> : vector<8x128xf32>
    %30 = tpu.matmul %26, %13, %cst_23 {dimension_numbers = #tpu.dot_dimension_numbers<[1], [0], [0], [1], [0, 0, 1, 1], [], []>} : vector<8x128xf32>, vector<128x128xf32>, vector<8x128xf32> -> vector<8x128xf32>
    %31 = arith.addf %29, %30 : vector<8x128xf32>
    %32 = math.tanh %31 : vector<8x128xf32>
    %c3_i32 = arith.constant 3 : i32
    %33 = arith.index_cast %c3_i32 : i32 to index
    %c0_24 = arith.constant 0 : index
    %c0_25 = arith.constant 0 : index
    %34 = vector.load %arg10[%33, %c0_24, %c0_25] : memref<8x8x128xf32, #tpu.memory_space<vmem>>, vector<1x8x128xf32>
    %35 = vector.shape_cast %34 : vector<1x8x128xf32> to vector<8x128xf32>
    %cst_26 = arith.constant dense<0.000000e+00> : vector<8x128xf32>
    %36 = tpu.matmul %32, %13, %cst_26 {dimension_numbers = #tpu.dot_dimension_numbers<[1], [0], [0], [1], [0, 0, 1, 1], [], []>} : vector<8x128xf32>, vector<128x128xf32>, vector<8x128xf32> -> vector<8x128xf32>
    %37 = arith.addf %35, %36 : vector<8x128xf32>
    %38 = math.tanh %37 : vector<8x128xf32>
    %c4_i32 = arith.constant 4 : i32
    %39 = arith.index_cast %c4_i32 : i32 to index
    %c0_27 = arith.constant 0 : index
    %c0_28 = arith.constant 0 : index
    %40 = vector.load %arg10[%39, %c0_27, %c0_28] : memref<8x8x128xf32, #tpu.memory_space<vmem>>, vector<1x8x128xf32>
    %41 = vector.shape_cast %40 : vector<1x8x128xf32> to vector<8x128xf32>
    %cst_29 = arith.constant dense<0.000000e+00> : vector<8x128xf32>
    %42 = tpu.matmul %38, %13, %cst_29 {dimension_numbers = #tpu.dot_dimension_numbers<[1], [0], [0], [1], [0, 0, 1, 1], [], []>} : vector<8x128xf32>, vector<128x128xf32>, vector<8x128xf32> -> vector<8x128xf32>
    %43 = arith.addf %41, %42 : vector<8x128xf32>
    %44 = math.tanh %43 : vector<8x128xf32>
    %c5_i32 = arith.constant 5 : i32
    %45 = arith.index_cast %c5_i32 : i32 to index
    %c0_30 = arith.constant 0 : index
    %c0_31 = arith.constant 0 : index
    %46 = vector.load %arg10[%45, %c0_30, %c0_31] : memref<8x8x128xf32, #tpu.memory_space<vmem>>, vector<1x8x128xf32>
    %47 = vector.shape_cast %46 : vector<1x8x128xf32> to vector<8x128xf32>
    %cst_32 = arith.constant dense<0.000000e+00> : vector<8x128xf32>
    %48 = tpu.matmul %44, %13, %cst_32 {dimension_numbers = #tpu.dot_dimension_numbers<[1], [0], [0], [1], [0, 0, 1, 1], [], []>} : vector<8x128xf32>, vector<128x128xf32>, vector<8x128xf32> -> vector<8x128xf32>
    %49 = arith.addf %47, %48 : vector<8x128xf32>
    %50 = math.tanh %49 : vector<8x128xf32>
    %c6_i32 = arith.constant 6 : i32
    %51 = arith.index_cast %c6_i32 : i32 to index
    %c0_33 = arith.constant 0 : index
    %c0_34 = arith.constant 0 : index
    %52 = vector.load %arg10[%51, %c0_33, %c0_34] : memref<8x8x128xf32, #tpu.memory_space<vmem>>, vector<1x8x128xf32>
    %53 = vector.shape_cast %52 : vector<1x8x128xf32> to vector<8x128xf32>
    %cst_35 = arith.constant dense<0.000000e+00> : vector<8x128xf32>
    %54 = tpu.matmul %50, %13, %cst_35 {dimension_numbers = #tpu.dot_dimension_numbers<[1], [0], [0], [1], [0, 0, 1, 1], [], []>} : vector<8x128xf32>, vector<128x128xf32>, vector<8x128xf32> -> vector<8x128xf32>
    %55 = arith.addf %53, %54 : vector<8x128xf32>
    %56 = math.tanh %55 : vector<8x128xf32>
    %c7_i32 = arith.constant 7 : i32
    %57 = arith.index_cast %c7_i32 : i32 to index
    %c0_36 = arith.constant 0 : index
    %c0_37 = arith.constant 0 : index
    %58 = vector.load %arg10[%57, %c0_36, %c0_37] : memref<8x8x128xf32, #tpu.memory_space<vmem>>, vector<1x8x128xf32>
    %59 = vector.shape_cast %58 : vector<1x8x128xf32> to vector<8x128xf32>
    %cst_38 = arith.constant dense<0.000000e+00> : vector<8x128xf32>
    %60 = tpu.matmul %56, %13, %cst_38 {dimension_numbers = #tpu.dot_dimension_numbers<[1], [0], [0], [1], [0, 0, 1, 1], [], []>} : vector<8x128xf32>, vector<128x128xf32>, vector<8x128xf32> -> vector<8x128xf32>
    %61 = arith.addf %59, %60 : vector<8x128xf32>
    %62 = math.tanh %61 : vector<8x128xf32>
    %c8_i32 = arith.constant 8 : i32
    %c0_39 = arith.constant 0 : index
    %c0_40 = arith.constant 0 : index
    %63 = vector.load %arg9[%c0_39, %c0_40] : memref<8x128xf32, #tpu.memory_space<vmem>>, vector<8x128xf32>
    tpu.vector_store %arg9[%c0_39, %c0_40], %62 {strides = array<i32>} : memref<8x128xf32, #tpu.memory_space<vmem>>, vector<8x128xf32>,
    %c0_i32_41 = arith.constant 0 : i32
    %64 = arith.cmpi eq, %arg1, %c0_i32_41 : i32
    %65 = arith.extui %64 : i1 to i32
    %c0_i32_42 = arith.constant 0 : i32
    %66 = arith.cmpi ne, %65, %c0_i32_42 : i32
    scf.if %66 {
      %c0_43 = arith.constant 0 : index
      %c0_44 = arith.constant 0 : index
      %67 = vector.load %arg9[%c0_43, %c0_44] : memref<8x128xf32, #tpu.memory_space<vmem>>, vector<8x128xf32>
      %c0_45 = arith.constant 0 : index
      %c0_46 = arith.constant 0 : index
      %68 = vector.load %arg6[%c0_45, %c0_46] : memref<128x128xf32, #tpu.memory_space<vmem>>, vector<128x128xf32>
      %cst_47 = arith.constant dense<0.000000e+00> : vector<8x128xf32>
      %69 = tpu.matmul %67, %68, %cst_47 {dimension_numbers = #tpu.dot_dimension_numbers<[1], [0], [0], [1], [0, 0, 1, 1], [], []>} : vector<8x128xf32>, vector<128x128xf32>, vector<8x128xf32> -> vector<8x128xf32>
      %c0_48 = arith.constant 0 : index
      %c0_49 = arith.constant 0 : index
      %70 = vector.load %arg7[%c0_48, %c0_49] : memref<1x128xf32, #tpu.memory_space<vmem>>, vector<1x128xf32>
      %71 = vector.broadcast %70 : vector<1x128xf32> to vector<8x128xf32>
      %72 = arith.addf %69, %71 : vector<8x128xf32>
      %c0_50 = arith.constant 0 : index
      %c0_51 = arith.constant 0 : index
      %73 = vector.load %arg8[%c0_50, %c0_51] : memref<8x128xf32, #tpu.memory_space<vmem>>, vector<8x128xf32>
      tpu.vector_store %arg8[%c0_50, %c0_51], %72 {strides = array<i32>} : memref<8x128xf32, #tpu.memory_space<vmem>>, vector<8x128xf32>,
    } else {
    }
    return
  }
  func.func @transform_0(%arg0: i32, %arg1: i32) -> (i32, i32, i32) {
    %c0_i32 = arith.constant 0 : i32
    %c0_i32_0 = arith.constant 0 : i32
    return %arg1, %arg0, %c0_i32 : i32, i32, i32
  }
  func.func @transform_1(%arg0: i32, %arg1: i32) -> (i32, i32) {
    %c0_i32 = arith.constant 0 : i32
    %c0_i32_0 = arith.constant 0 : i32
    %c0_i32_1 = arith.constant 0 : i32
    return %c0_i32, %c0_i32_0 : i32, i32
  }
  func.func @transform_2(%arg0: i32, %arg1: i32) -> (i32, i32) {
    %c0_i32 = arith.constant 0 : i32
    %c0_i32_0 = arith.constant 0 : i32
    %c0_i32_1 = arith.constant 0 : i32
    return %c0_i32, %c0_i32_0 : i32, i32
  }
  func.func @transform_3(%arg0: i32, %arg1: i32) -> (i32, i32) {
    %c0_i32 = arith.constant 0 : i32
    %c0_i32_0 = arith.constant 0 : i32
    %c0_i32_1 = arith.constant 0 : i32
    return %c0_i32, %c0_i32_0 : i32, i32
  }
  func.func @transform_4(%arg0: i32, %arg1: i32) -> (i32, i32) {
    %c0_i32 = arith.constant 0 : i32
    %c0_i32_0 = arith.constant 0 : i32
    %c0_i32_1 = arith.constant 0 : i32
    return %c0_i32, %c0_i32_0 : i32, i32
  }
  func.func @transform_5(%arg0: i32, %arg1: i32) -> (i32, i32) {
    %c0_i32 = arith.constant 0 : i32
    %c0_i32_0 = arith.constant 0 : i32
    %c0_i32_1 = arith.constant 0 : i32
    return %c0_i32, %c0_i32_0 : i32, i32
  }
  func.func @transform_6(%arg0: i32, %arg1: i32) -> (i32, i32) {
    %c0_i32 = arith.constant 0 : i32
    %c0_i32_0 = arith.constant 0 : i32
    return %arg0, %c0_i32 : i32, i32
  }
}

</mosaic_0001>

<bundles_post_ra>
// kernel: tpu_custom_call.1
= control target key start
LH: loop header
LB: loop body
LE: loop exit
PB: predicated region body
PF: predicated region fallthrough
CT: control target
= control target key end

     0   :  { %11 = vsyncpa [#allocation5], 0  ;;  %s2220_s0 = inlined_call_operand.hbm [shape: f32[8,8,128], index: 0, kind: input, shape index: {}]   ;;  %s2221_s1 = inlined_call_operand.hbm [shape: f32[128,128], index: 1, kind: input, shape index: {}]   ;;  %s2222_s2 = inlined_call_operand.hbm [shape: f32[128,128], index: 2, kind: input, shape index: {}]   ;;  %s2223_s3 = inlined_call_operand.vmem [shape: f32[1,128], index: 3, kind: input, shape index: {}]   ;;  %s2224_s4 = inlined_call_operand.hbm [shape: f32[128,128], index: 4, kind: input, shape index: {}]   ;;  %s2225_s5 = inlined_call_operand.vmem [shape: f32[1,128], index: 5, kind: input, shape index: {}]   ;;  %s2226_s6 = inlined_call_operand.hbm [shape: f32[8,128], index: 6, kind: output, shape index: {}]  }
   0x1   :  { %12 = vsyncpa [#allocation8], 0 }
   0x2   :  { %13 = vsyncpa [#allocation11], 0 }
   0x3   :  { %14 = vsyncpa [#allocation6], 0  ;;  %s1890_s21 = smov [#allocation7]   ;;  %s1891_s23 = smov [#allocation4]  }
   0x4   :  { %s32_s22 = sshll.u32 %s1890_s21, 4  ;;  %s20_s24 = sshll.u32 %s1891_s23, 4  ;;  %s33_s22 = int_to_ptr.vmem [resolvable:$true] %s32_s22  ;;  %s1935_s24 = int_to_ptr.vmem [resolvable:$true] %s20_s24 }
   0x5   :  { %s1772_s27 = scalar_lea.hbm %s2221_s1, 2048 }
   0x6   :  { %p1773_p0 = scmp.ne.s32.totalorder %s2221_s1, %s1772_s27  ;;  %p1776_p1 = scmp.lt.u32.totalorder %s1772_s27, %s2221_s1 }
   0x8   :  { %p1778_p2 = pnand %p1776_p1, %p1773_p0 }
   0xa   :  { %1781 = shalt.err (!%p1778_p2)
}
   0xb   :  { %s1782_s8 = scalar_lea.vmem %s33_s22, 2048  ;;  %p1787_p4 = scmp.lt.s32.totalorder %s33_s22, %s33_s22 }
   0xc   :  { %p1783_p3 = scmp.ne.s32.totalorder %s33_s22, %s1782_s8  ;;  %p1788_p5 = scmp.lt.s32.totalorder %s1782_s8, %s1782_s8 }
   0xe   :  { %p1789_p6 = por %p1788_p5, %p1787_p4 }
  0x10   :  { %p1790_p7 = pnand %p1789_p6, %p1783_p3 }
  0x12   :  { %1793 = shalt.err (!%p1790_p7)
}
  0x13   :  { %s1892_s9 = smov 128   ;;  %s1893_s10 = smov 8  }
  0x14   :  { %38 = dma.hbm_to_vmem [thread:$0]  %s2221_s1, 2048, %s33_s22, [#allocation8], %s1892_s9, %s1892_s9, %s1893_s10  }
  0x15   :  { %s1794_s15 = scalar_lea.hbm %s2220_s0, 1024 }
  0x16   :  { %p1795_p8 = scmp.ne.s32.totalorder %s2220_s0, %s1794_s15  ;;  %p1798_p9 = scmp.lt.u32.totalorder %s1794_s15, %s2220_s0 }
  0x18   :  { %p1800_p10 = pnand %p1798_p9, %p1795_p8 }
  0x1a   :  { %1803 = shalt.err (!%p1800_p10)
}
  0x1b   :  { %s1804_s20 = scalar_lea.vmem %s1935_s24, 1024  ;;  %p1809_p12 = scmp.lt.s32.totalorder %s1935_s24, %s1935_s24 }
  0x1c   :  { %p1805_p11 = scmp.ne.s32.totalorder %s1935_s24, %s1804_s20  ;;  %p1810_p13 = scmp.lt.s32.totalorder %s1804_s20, %s1804_s20 }
  0x1e   :  { %p1811_p0 = por %p1810_p13, %p1809_p12 }
  0x20   :  { %p1812_p1 = pnand %p1811_p0, %p1805_p11 }
  0x22   :  { %1815 = shalt.err (!%p1812_p1)
}
  0x23   :  { %26 = dma.hbm_to_vmem [thread:$0]  %s2220_s0, 1024, %s1935_s24, [#allocation5], %s1892_s9, %s1892_s9, %s1893_s10  }
  0x24   :  { %s1894_s22 = smov [#allocation9]   ;;  %s1895_s25 = smov [#allocation10]  }
  0x25   :  { %s44_s23 = sshll.u32 %s1894_s22, 4  ;;  %s58_s26 = sshll.u32 %s1895_s25, 4  ;;  %s45_s23 = int_to_ptr.vmem [resolvable:$true] %s44_s23  ;;  %s1972_s26 = int_to_ptr.vmem [resolvable:$true] %s58_s26 }
  0x26   :  { %s1816_s29 = scalar_lea.hbm %s2222_s2, 2048 }
  0x27   :  { %p1817_p2 = scmp.ne.s32.totalorder %s2222_s2, %s1816_s29  ;;  %p1820_p3 = scmp.lt.u32.totalorder %s1816_s29, %s2222_s2 }
  0x29   :  { %p1822_p4 = pnand %p1820_p3, %p1817_p2 }
  0x2b   :  { %1825 = shalt.err (!%p1822_p4)
}
  0x2c   :  { %s1826_s0 = scalar_lea.vmem %s45_s23, 2048  ;;  %p1831_p6 = scmp.lt.s32.totalorder %s45_s23, %s45_s23 }
  0x2d   :  { %p1827_p5 = scmp.ne.s32.totalorder %s45_s23, %s1826_s0  ;;  %p1832_p7 = scmp.lt.s32.totalorder %s1826_s0, %s1826_s0 }
  0x2f   :  { %p1833_p8 = por %p1832_p7, %p1831_p6 }
  0x31   :  { %p1834_p9 = pnand %p1833_p8, %p1827_p5 }
  0x33   :  { %1837 = shalt.err (!%p1834_p9)
}
  0x34   :  { %50 = dma.hbm_to_vmem [thread:$0]  %s2222_s2, 2048, %s45_s23, [#allocation8], %s1892_s9, %s1892_s9, %s1893_s10  }
  0x35   :  { %s1838_s15 = scalar_lea.hbm %s2224_s4, 2048 }
  0x36   :  { %p1839_p10 = scmp.ne.s32.totalorder %s2224_s4, %s1838_s15  ;;  %p1842_p11 = scmp.lt.u32.totalorder %s1838_s15, %s2224_s4 }
  0x38   :  { %p1844_p12 = pnand %p1842_p11, %p1839_p10 }
  0x3a   :  { %1847 = shalt.err (!%p1844_p12)
}
  0x3b   :  { %s1848_s20 = scalar_lea.vmem %s1972_s26, 2048  ;;  %p1853_p0 = scmp.lt.s32.totalorder %s1972_s26, %s1972_s26 }
  0x3c   :  { %p1849_p13 = scmp.ne.s32.totalorder %s1972_s26, %s1848_s20  ;;  %p1854_p1 = scmp.lt.s32.totalorder %s1848_s20, %s1848_s20 }
  0x3e   :  { %p1855_p2 = por %p1854_p1, %p1853_p0 }
  0x40   :  { %p1856_p3 = pnand %p1855_p2, %p1849_p13 }
  0x42   :  { %1859 = shalt.err (!%p1856_p3)
}
  0x43   :  { %64 = dma.hbm_to_vmem [thread:$0]  %s2224_s4, 2048, %s1972_s26, [#allocation11], %s1892_s9, %s1892_s9, %s1893_s10  }
  0x44   :  { %1882 = dma.done.wait [#allocation5], 1024  }
  0x45   :  { %1883 = vsyncadd [#allocation5], 4294966272 }
  0x46   :  { %1884 = dma.done.wait [#allocation8], 4096  }
  0x47   :  { %1885 = vsyncadd [#allocation8], 4294963200 }
  0x48   :  { %1886 = dma.done.wait [#allocation11], 2048  }
  0x49   :  { %1887 = vsyncadd [#allocation11], 4294965248  ;;  %v1896_v0 = vmov 0.0|0.0   ;;  %vm1897_vm0 = vmmov 0   ;;  %v1898_v1 = vmov 0.0   ;;  %v92_v2 = vld [vmem:[#allocation7] sm:$0xff] }
  0x4a   :  { %1530 = vmatprep.subr.bf16.mxu1 %v1896_v0  ;;  %1215 = vmatprep.mubr.msk.f32.mxu1 %vm1897_vm0, %v1898_v1  ;;  %v93_v3 = vld [vmem:[#allocation7 + $0x8] sm:$0xff]  ;;  %v236_v4 = vld [vmem:[#allocation9] sm:$0xff]  ;;  %v94_v7 = vld [vmem:[#allocation7 + $0x10] sm:$0xff]  ;;  %s1899_s21 = smov [#allocation12]  }
  0x4b   :  { %v1498_v5 = vpack.c.bf16 %v93_v3, %v92_v2  ;;  %v237_v6 = vld [vmem:[#allocation9 + $0x8] sm:$0xff]  ;;  %v95_v8 = vld [vmem:[#allocation7 + $0x18] sm:$0xff]  ;;  %v238_v11 = vld [vmem:[#allocation9 + $0x10] sm:$0xff]  ;;  %s949_s22 = sshll.u32 %s1899_s21, 4  ;;  %s950_s22 = int_to_ptr.vmem [resolvable:$true] %s949_s22 }
  0x4c   :  { %v2012_v9 = vpack.c.bf16 %v237_v6, %v236_v4  ;;  %v1502_v10 = vpack.c.bf16 %v95_v8, %v94_v7  ;;  %v239_v12 = vld [vmem:[#allocation9 + $0x18] sm:$0xff]  ;;  %v96_v13 = vld [vmem:[#allocation7 + $0x20] sm:$0xff]  ;;  %v97_v14 = vld [vmem:[#allocation7 + $0x28] sm:$0xff]  ;;  %s1860_s23 = scalar_lea.vmem %s950_s22, 128  ;;  %p1865_p5 = scmp.lt.s32.totalorder %s950_s22, %s950_s22 }
  0x4d   :  { %1499 = vmatprep.subr.bf16.mxu0 %v1498_v5  ;;  %v2015_v15 = vpack.c.bf16 %v239_v12, %v238_v11  ;;  %v1506_v16 = vpack.c.bf16 %v97_v14, %v96_v13  ;;  %v240_v17 = vld [vmem:[#allocation9 + $0x20] sm:$0xff]  ;;  %v241_v18 = vld [vmem:[#allocation9 + $0x28] sm:$0xff]  ;;  %v98_v19 = vld [vmem:[#allocation7 + $0x30] sm:$0xff]  ;;  %p1861_p4 = scmp.ne.s32.totalorder %s950_s22, %s1860_s23  ;;  %p1866_p6 = scmp.lt.s32.totalorder %s1860_s23, %s1860_s23 }
  0x4e   :  { %1501 = vmatpush3.bf16.msra.mxu0 %v1498_v5  ;;  %1532 = vmatpush3.bf16.msra.mxu1 %v2012_v9  ;;  %v99_v20 = vld [vmem:[#allocation7 + $0x38] sm:$0xff]  ;;  %v2019_v21 = vpack.c.bf16 %v241_v18, %v240_v17  ;;  %v242_v23 = vld [vmem:[#allocation9 + $0x30] sm:$0xff]  ;;  %v100_v25 = vld [vmem:[#allocation7 + $0x40] sm:$0xff] }
  0x4f   :  { %1503 = vmatprep.subr.bf16.mxu0 %v1502_v10  ;;  %1533 = vmatprep.subr.bf16.mxu1 %v1896_v0  ;;  %v1510_v22 = vpack.c.bf16 %v99_v20, %v98_v19  ;;  %v243_v24 = vld [vmem:[#allocation9 + $0x38] sm:$0xff]  ;;  %v101_v26 = vld [vmem:[#allocation7 + $0x48] sm:$0xff]  ;;  %v84_v27 = vld [vmem:[#allocation4] sm:$0xff]  ;;  %p1867_p7 = por %p1866_p6, %p1865_p5 }
  0x50   :  { %1171 = vmatprep.mubr.f32.mxu0 %v84_v27  ;;  %v2023_v28 = vpack.c.bf16 %v243_v24, %v242_v23  ;;  %v1514_v29 = vpack.c.bf16 %v101_v26, %v100_v25  ;;  %v244_v30 = vld [vmem:[#allocation9 + $0x40] sm:$0xff]  ;;  %v245_v31 = vld [vmem:[#allocation9 + $0x48] sm:$0xff]  ;;  %v102_v32 = vld [vmem:[#allocation7 + $0x50] sm:$0xff] }
  0x51   :  { %v103_v33 = vld [vmem:[#allocation7 + $0x58] sm:$0xff]  ;;  %v2027_v34 = vpack.c.bf16 %v245_v31, %v244_v30  ;;  %v246_v36 = vld [vmem:[#allocation9 + $0x50] sm:$0xff]  ;;  %v104_v38 = vld [vmem:[#allocation7 + $0x60] sm:$0xff]  ;;  %p1868_p8 = pnand %p1867_p7, %p1861_p4 }
  0x52   :  { %1505 = vmatpush3.bf16.msra.mxu0 %v1502_v10  ;;  %1535 = vmatpush3.bf16.msra.mxu1 %v2015_v15  ;;  %v1518_v35 = vpack.c.bf16 %v103_v33, %v102_v32  ;;  %v247_v37 = vld [vmem:[#allocation9 + $0x58] sm:$0xff]  ;;  %v105_v39 = vld [vmem:[#allocation7 + $0x68] sm:$0xff]  ;;  %v248_v42 = vld [vmem:[#allocation9 + $0x60] sm:$0xff] }
  0x53   :  { %1507 = vmatprep.subr.bf16.mxu0 %v1506_v16  ;;  %1536 = vmatprep.subr.bf16.mxu1 %v1896_v0  ;;  %v2031_v40 = vpack.c.bf16 %v247_v37, %v246_v36  ;;  %v1522_v41 = vpack.c.bf16 %v105_v39, %v104_v38  ;;  %v249_v43 = vld [vmem:[#allocation9 + $0x68] sm:$0xff]  ;;  %v106_v44 = vld [vmem:[#allocation7 + $0x70] sm:$0xff]  ;;  %v107_v45 = vld [vmem:[#allocation7 + $0x78] sm:$0xff] }
  0x54   :  { %v2035_v46 = vpack.c.bf16 %v249_v43, %v248_v42  ;;  %v1526_v47 = vpack.c.bf16 %v107_v45, %v106_v44  ;;  %v250_v48 = vld [vmem:[#allocation9 + $0x70] sm:$0xff]  ;;  %v251_v49 = vld [vmem:[#allocation9 + $0x78] sm:$0xff]  ;;  %v85_v51 = vld [vmem:[#allocation4 + $0x8] sm:$0xff] }
  0x55   :  { %v2039_v50 = vpack.c.bf16 %v251_v49, %v250_v48  ;;  %v86_v52 = vld [vmem:[#allocation4 + $0x10] sm:$0xff]  ;;  %v87_v53 = vld [vmem:[#allocation4 + $0x18] sm:$0xff]  ;;  %v88_v54 = vld [vmem:[#allocation4 + $0x20] sm:$0xff] }
  0x56   :  { %1509 = vmatpush3.bf16.msra.mxu0 %v1506_v16  ;;  %1538 = vmatpush3.bf16.msra.mxu1 %v2019_v21  ;;  %v89_v55 = vld [vmem:[#allocation4 + $0x28] sm:$0xff]  ;;  %v90_v56 = vld [vmem:[#allocation4 + $0x30] sm:$0xff]  ;;  %v91_v57 = vld [vmem:[#allocation4 + $0x38] sm:$0xff] }
  0x57   :  { %1511 = vmatprep.subr.bf16.mxu0 %v1510_v22  ;;  %1539 = vmatprep.subr.bf16.mxu1 %v1896_v0  ;;  %v2085_v58 = vld [vmem:[%s2223_s3] ss:$0 sm:$0xff]  ;;  %v850_v36 = vld [vmem:[#allocation10 + $0x8] sm:$0xff]  ;;  %v851_v37 = vld [vmem:[#allocation10 + $0x10] sm:$0xff] }
  0x58   :  { %v852_v39 = vld [vmem:[#allocation10 + $0x18] sm:$0xff]  ;;  %v854_v42 = vld [vmem:[#allocation10 + $0x28] sm:$0xff]  ;;  %v855_v44 = vld [vmem:[#allocation10 + $0x30] sm:$0xff] }
  0x59   :  { %v856_v45 = vld [vmem:[#allocation10 + $0x38] sm:$0xff] }
  0x5a   :  { %1513 = vmatpush3.bf16.msra.mxu0 %v1510_v22  ;;  %1541 = vmatpush3.bf16.msra.mxu1 %v2023_v28 }
  0x5b   :  { %1515 = vmatprep.subr.bf16.mxu0 %v1514_v29  ;;  %1542 = vmatprep.subr.bf16.mxu1 %v1896_v0 }
  0x5e   :  { %1517 = vmatpush3.bf16.msra.mxu0 %v1514_v29  ;;  %1544 = vmatpush3.bf16.msra.mxu1 %v2027_v34 }
  0x5f   :  { %1519 = vmatprep.subr.bf16.mxu0 %v1518_v35  ;;  %1545 = vmatprep.subr.bf16.mxu1 %v1896_v0 }
  0x62   :  { %1521 = vmatpush3.bf16.msra.mxu0 %v1518_v35  ;;  %1547 = vmatpush3.bf16.msra.mxu1 %v2031_v40  ;;  %v849_v35 = vld [vmem:[#allocation10] sm:$0xff] }
  0x63   :  { %1523 = vmatprep.subr.bf16.mxu0 %v1522_v41  ;;  %1548 = vmatprep.subr.bf16.mxu1 %v1896_v0  ;;  %v1723_v38 = vpack.c.bf16 %v850_v36, %v849_v35 }
  0x66   :  { %1525 = vmatpush3.bf16.msra.mxu0 %v1522_v41  ;;  %1550 = vmatpush3.bf16.msra.mxu1 %v2035_v46  ;;  %v853_v41 = vld [vmem:[#allocation10 + $0x20] sm:$0xff] }
  0x67   :  { %1527 = vmatprep.subr.bf16.mxu0 %v1526_v47  ;;  %1551 = vmatprep.subr.bf16.mxu1 %v1896_v0  ;;  %v1729_v43 = vpack.c.bf16 %v854_v42, %v853_v41 }
  0x6a   :  { %1529 = vmatpush3.bf16.msra.mxu0 %v1526_v47  ;;  %1553 = vmatpush3.bf16.msra.mxu1 %v2039_v50  ;;  %v858_v47 = vld [vmem:[#allocation10 + $0x48] sm:$0xff] }
  0x6b   :  { %1554 = vmatprep.subr.bf16.mxu0 %v1896_v0  ;;  %1578 = vmatprep.subr.bf16.mxu1 %v1896_v0 }
  0x6d   :  { %1172 = vmatmul.mubr.f32.vlgmr.msra.gmra.mrb[0].mxu0 %v85_v51  ;;  %1216 = vmatmul.mubr.f32.vlgmr.msra.gmra.mrb[0].mxu1 %v1898_v1 }
  0x6e   :  { %1556 = vmatpush3.bf16.msra.mxu0 %v2012_v9  ;;  %1580 = vmatpush3.bf16.msra.mxu1 %v2012_v9 }
  0x6f   :  { %1557 = vmatprep.subr.bf16.mxu0 %v1896_v0  ;;  %1581 = vmatprep.subr.bf16.mxu1 %v1896_v0 }
  0x70   :  { %1285 = vmatprep.mubr.msk.f32.mxu1 %vm1897_vm0, %v1898_v1  ;;  %1174 = vmatprep.mubr.f32.mxu0 %v86_v52 }
  0x71   :  { %1175 = vmatmul.mubr.f32.gmra.mrb[2].mxu0 %v87_v53 }
  0x72   :  { %1559 = vmatpush3.bf16.msra.mxu0 %v2015_v15  ;;  %1583 = vmatpush3.bf16.msra.mxu1 %v2015_v15 }
  0x73   :  { %1560 = vmatprep.subr.bf16.mxu0 %v1896_v0  ;;  %1584 = vmatprep.subr.bf16.mxu1 %v1896_v0 }
  0x74   :  { %1177 = vmatprep.mubr.f32.mxu0 %v88_v54  ;;  %v859_v54 = vld [vmem:[#allocation10 + $0x50] sm:$0xff] }
  0x75   :  { %1178 = vmatmul.mubr.f32.gmra.mrb[4].mxu0 %v89_v55  ;;  %v860_v55 = vld [vmem:[#allocation10 + $0x58] sm:$0xff] }
  0x76   :  { %1562 = vmatpush3.bf16.msra.mxu0 %v2019_v21  ;;  %1586 = vmatpush3.bf16.msra.mxu1 %v2019_v21 }
  0x77   :  { %1563 = vmatprep.subr.bf16.mxu0 %v1896_v0  ;;  %1587 = vmatprep.subr.bf16.mxu1 %v1896_v0 }
  0x78   :  { %1180 = vmatprep.mubr.f32.mxu0 %v90_v56  ;;  %v1738_v56 = vpack.c.bf16 %v860_v55, %v859_v54 }
  0x79   :  { %1181 = vmatmul.mubr.f32.gmra.mrb[6].mxu0 %v91_v57  ;;  %v861_v57 = vld [vmem:[#allocation10 + $0x60] sm:$0xff] }
  0x7a   :  { %1565 = vmatpush3.bf16.msra.mxu0 %v2023_v28  ;;  %1589 = vmatpush3.bf16.msra.mxu1 %v2023_v28 }
  0x7b   :  { %1566 = vmatprep.subr.bf16.mxu0 %v1896_v0  ;;  %1590 = vmatprep.subr.bf16.mxu1 %v1896_v0 }
  0x7c   :  { %1250 = vmatprep.mubr.msk.f32.mxu0 %vm1897_vm0, %v1898_v1 }
  0x7e   :  { %1568 = vmatpush3.bf16.msra.mxu0 %v2027_v34  ;;  %1592 = vmatpush3.bf16.msra.mxu1 %v2027_v34 }
  0x7f   :  { %1569 = vmatprep.subr.bf16.mxu0 %v1896_v0  ;;  %1593 = vmatprep.subr.bf16.mxu1 %v1896_v0 }
  0x82   :  { %1571 = vmatpush3.bf16.msra.mxu0 %v2031_v40  ;;  %1595 = vmatpush3.bf16.msra.mxu1 %v2031_v40 }
  0x83   :  { %1572 = vmatprep.subr.bf16.mxu0 %v1896_v0  ;;  %1596 = vmatprep.subr.bf16.mxu1 %v1896_v0 }
  0x86   :  { %1574 = vmatpush3.bf16.msra.mxu0 %v2035_v46  ;;  %1598 = vmatpush3.bf16.msra.mxu1 %v2035_v46 }
  0x87   :  { %1575 = vmatprep.subr.bf16.mxu0 %v1896_v0  ;;  %1599 = vmatprep.subr.bf16.mxu1 %v1896_v0 }
  0x8a   :  { %1577 = vmatpush3.bf16.msra.mxu0 %v2039_v50  ;;  %1601 = vmatpush3.bf16.msra.mxu1 %v2039_v50 }
  0x8b   :  { %1602 = vmatprep.subr.bf16.mxu0 %v1896_v0  ;;  %1626 = vmatprep.subr.bf16.mxu1 %v1896_v0 }
 0x140   :  { %v1173_v59 = vpop.f32.mrb[0].mxu0  ;;  %v320_v60 = vpop.f32.mrb[0].mxu1 }
 0x141   :  { %v174_v61 = vpop.f32.mrb[1].mxu0  ;;  %v1217_v62 = vpop.f32.mrb[1].mxu1  ;;  %v221_v11 = vadd.f32 %v1173_v59, %v2085_v58  ;;  %v862_v59 = vld [vmem:[#allocation10 + $0x68] sm:$0xff] }
 0x142   :  { %v220_v63 = vadd.f32 %v2085_v58, %v174_v61  ;;  %v863_v61 = vld [vmem:[#allocation10 + $0x70] sm:$0xff]  ;;  %v864_v62 = vld [vmem:[#allocation10 + $0x78] sm:$0xff] }
 0x144   :  { %v324_v2 = vadd.f32 %v320_v60, %v220_v63  ;;  %v1176_v4 = vpop.f32.mrb[2].mxu0  ;;  %v1741_v60 = vpack.c.bf16 %v862_v59, %v861_v57  ;;  %v1744_v63 = vpack.c.bf16 %v864_v62, %v863_v61 }
 0x145   :  { %v184_v5 = vpop.f32.mrb[3].mxu0  ;;  %v223_v23 = vadd.f32 %v1176_v4, %v2085_v58 }
 0x146   :  { %1756 = vtanh.f32 %v324_v2  ;;  %v222_v17 = vadd.f32 %v2085_v58, %v184_v5 }
 0x148   :  { %v2106_v6 = vpop.f32.mrb[4].mxu0 }
 0x149   :  { %v2108_v7 = vpop.f32.mrb[5].mxu0 }
 0x14a   :  { %v224_v29 = vadd.f32 %v2085_v58, %v2108_v7  ;;  %v961_v7 = vld [vmem:[%s2225_s5] ss:$0 sm:$0xff] }
 0x14c   :  { %v2110_v8 = vpop.f32.mrb[6].mxu0 }
 0x14d   :  { %v2112_v10 = vpop.f32.mrb[7].mxu0  ;;  %v227_v2 = vadd.f32 %v2110_v8, %v2085_v58 }
 0x14e   :  { %v226_v49 = vadd.f32 %v2085_v58, %v2112_v10 }
 0x150   :  { %v1757_v3 = vpop.eup %1756 }
 0x151   :  { %1251 = vmatmul.mubr.f32.vlgmr.msra.gmra.mrb[8].mxu0 %v1757_v3 }
 0x152   :  { %1604 = vmatpush3.bf16.msra.mxu0 %v2012_v9  ;;  %1320 = vmatprep.mubr.msk.f32.mxu0 %vm1897_vm0, %v1898_v1 }
 0x153   :  { %1605 = vmatprep.subr.bf16.mxu0 %v1896_v0 }
 0x156   :  { %1607 = vmatpush3.bf16.msra.mxu0 %v2015_v15 }
 0x157   :  { %1608 = vmatprep.subr.bf16.mxu0 %v1896_v0 }
 0x15a   :  { %1610 = vmatpush3.bf16.msra.mxu0 %v2019_v21 }
 0x15b   :  { %1611 = vmatprep.subr.bf16.mxu0 %v1896_v0 }
 0x15e   :  { %1613 = vmatpush3.bf16.msra.mxu0 %v2023_v28 }
 0x15f   :  { %1614 = vmatprep.subr.bf16.mxu0 %v1896_v0 }
 0x162   :  { %1616 = vmatpush3.bf16.msra.mxu0 %v2027_v34 }
 0x163   :  { %1617 = vmatprep.subr.bf16.mxu0 %v1896_v0 }
 0x166   :  { %1619 = vmatpush3.bf16.msra.mxu0 %v2031_v40 }
 0x167   :  { %1620 = vmatprep.subr.bf16.mxu0 %v1896_v0 }
 0x16a   :  { %1622 = vmatpush3.bf16.msra.mxu0 %v2035_v46 }
 0x16b   :  { %1623 = vmatprep.subr.bf16.mxu0 %v1896_v0 }
 0x16e   :  { %1625 = vmatpush3.bf16.msra.mxu0 %v2039_v50 }
 0x16f   :  { %1650 = vmatprep.subr.bf16.mxu0 %v1896_v0 }
 0x224   :  { %v394_v12 = vpop.f32.mrb[8].mxu0 }
 0x225   :  { %v398_v13 = vadd.f32 %v394_v12, %v221_v11  ;;  %v1252_v14 = vpop.f32.mrb[9].mxu0 }
 0x227   :  { %1758 = vtanh.f32 %v398_v13 }
 0x231   :  { %v1759_v16 = vpop.eup %1758 }
 0x232   :  { %1286 = vmatmul.mubr.f32.vlgmr.msra.gmra.mrb[2].mxu1 %v1759_v16 }
 0x233   :  { %1628 = vmatpush3.bf16.msra.mxu1 %v2012_v9  ;;  %1355 = vmatprep.mubr.msk.f32.mxu1 %vm1897_vm0, %v1898_v1 }
 0x234   :  { %1629 = vmatprep.subr.bf16.mxu1 %v1896_v0 }
 0x237   :  { %1631 = vmatpush3.bf16.msra.mxu1 %v2015_v15 }
 0x238   :  { %1632 = vmatprep.subr.bf16.mxu1 %v1896_v0 }
 0x23b   :  { %1634 = vmatpush3.bf16.msra.mxu1 %v2019_v21 }
 0x23c   :  { %1635 = vmatprep.subr.bf16.mxu1 %v1896_v0 }
 0x23f   :  { %1637 = vmatpush3.bf16.msra.mxu1 %v2023_v28 }
 0x240   :  { %1638 = vmatprep.subr.bf16.mxu1 %v1896_v0 }
 0x243   :  { %1640 = vmatpush3.bf16.msra.mxu1 %v2027_v34 }
 0x244   :  { %1641 = vmatprep.subr.bf16.mxu1 %v1896_v0 }
 0x247   :  { %1643 = vmatpush3.bf16.msra.mxu1 %v2031_v40 }
 0x248   :  { %1644 = vmatprep.subr.bf16.mxu1 %v1896_v0 }
 0x24b   :  { %1646 = vmatpush3.bf16.msra.mxu1 %v2035_v46 }
 0x24c   :  { %1647 = vmatprep.subr.bf16.mxu1 %v1896_v0 }
 0x24f   :  { %1649 = vmatpush3.bf16.msra.mxu1 %v2039_v50 }
 0x250   :  { %1674 = vmatprep.subr.bf16.mxu1 %v1896_v0 }
 0x305   :  { %v468_v18 = vpop.f32.mrb[2].mxu1 }
 0x306   :  { %v472_v19 = vadd.f32 %v468_v18, %v222_v17  ;;  %v1287_v20 = vpop.f32.mrb[3].mxu1 }
 0x308   :  { %1760 = vtanh.f32 %v472_v19 }
 0x312   :  { %v1761_v22 = vpop.eup %1760 }
 0x313   :  { %1321 = vmatmul.mubr.f32.vlgmr.msra.gmra.mrb[10].mxu0 %v1761_v22 }
 0x314   :  { %1652 = vmatpush3.bf16.msra.mxu0 %v2012_v9  ;;  %1390 = vmatprep.mubr.msk.f32.mxu0 %vm1897_vm0, %v1898_v1 }
 0x315   :  { %1653 = vmatprep.subr.bf16.mxu0 %v1896_v0 }
 0x318   :  { %1655 = vmatpush3.bf16.msra.mxu0 %v2015_v15 }
 0x319   :  { %1656 = vmatprep.subr.bf16.mxu0 %v1896_v0 }
 0x31c   :  { %1658 = vmatpush3.bf16.msra.mxu0 %v2019_v21 }
 0x31d   :  { %1659 = vmatprep.subr.bf16.mxu0 %v1896_v0 }
 0x320   :  { %1661 = vmatpush3.bf16.msra.mxu0 %v2023_v28 }
 0x321   :  { %1662 = vmatprep.subr.bf16.mxu0 %v1896_v0 }
 0x324   :  { %1664 = vmatpush3.bf16.msra.mxu0 %v2027_v34 }
 0x325   :  { %1665 = vmatprep.subr.bf16.mxu0 %v1896_v0 }
 0x328   :  { %1667 = vmatpush3.bf16.msra.mxu0 %v2031_v40 }
 0x329   :  { %1668 = vmatprep.subr.bf16.mxu0 %v1896_v0 }
 0x32c   :  { %1670 = vmatpush3.bf16.msra.mxu0 %v2035_v46 }
 0x32d   :  { %1671 = vmatprep.subr.bf16.mxu0 %v1896_v0 }
 0x330   :  { %1673 = vmatpush3.bf16.msra.mxu0 %v2039_v50 }
 0x331   :  { %1698 = vmatprep.subr.bf16.mxu0 %v1896_v0 }
 0x3e6   :  { %v542_v24 = vpop.f32.mrb[10].mxu0 }
 0x3e7   :  { %v546_v25 = vadd.f32 %v542_v24, %v223_v23  ;;  %v1322_v26 = vpop.f32.mrb[11].mxu0 }
 0x3e9   :  { %1762 = vtanh.f32 %v546_v25 }
 0x3f3   :  { %v1763_v27 = vpop.eup %1762 }
 0x3f4   :  { %1356 = vmatmul.mubr.f32.vlgmr.msra.gmra.mrb[4].mxu1 %v1763_v27 }
 0x3f5   :  { %1676 = vmatpush3.bf16.msra.mxu1 %v2012_v9  ;;  %1425 = vmatprep.mubr.msk.f32.mxu1 %vm1897_vm0, %v1898_v1 }
 0x3f6   :  { %1677 = vmatprep.subr.bf16.mxu1 %v1896_v0 }
 0x3f9   :  { %1679 = vmatpush3.bf16.msra.mxu1 %v2015_v15 }
 0x3fa   :  { %1680 = vmatprep.subr.bf16.mxu1 %v1896_v0 }
 0x3fd   :  { %1682 = vmatpush3.bf16.msra.mxu1 %v2019_v21 }
 0x3fe   :  { %1683 = vmatprep.subr.bf16.mxu1 %v1896_v0 }
 0x401   :  { %1685 = vmatpush3.bf16.msra.mxu1 %v2023_v28 }
 0x402   :  { %1686 = vmatprep.subr.bf16.mxu1 %v1896_v0 }
 0x405   :  { %1688 = vmatpush3.bf16.msra.mxu1 %v2027_v34 }
 0x406   :  { %1689 = vmatprep.subr.bf16.mxu1 %v1896_v0 }
 0x409   :  { %1691 = vmatpush3.bf16.msra.mxu1 %v2031_v40 }
 0x40a   :  { %1692 = vmatprep.subr.bf16.mxu1 %v1896_v0 }
 0x40d   :  { %1694 = vmatpush3.bf16.msra.mxu1 %v2035_v46 }
 0x40e   :  { %1695 = vmatprep.subr.bf16.mxu1 %v1896_v0 }
 0x411   :  { %1697 = vmatpush3.bf16.msra.mxu1 %v2039_v50 }
 0x412   :  { %1722 = vmatprep.subr.bf16.mxu1 %v1896_v0 }
 0x4c7   :  { %v616_v30 = vpop.f32.mrb[4].mxu1 }
 0x4c8   :  { %v620_v31 = vadd.f32 %v616_v30, %v224_v29  ;;  %v1357_v32 = vpop.f32.mrb[5].mxu1 }
 0x4ca   :  { %1764 = vtanh.f32 %v620_v31 }
 0x4d4   :  { %v1765_v33 = vpop.eup %1764 }
 0x4d5   :  { %1391 = vmatmul.mubr.f32.vlgmr.msra.gmra.mrb[12].mxu0 %v1765_v33 }
 0x4d6   :  { %1700 = vmatpush3.bf16.msra.mxu0 %v2012_v9  ;;  %1460 = vmatprep.mubr.msk.f32.mxu0 %vm1897_vm0, %v1898_v1  ;;  %v225_v9 = vadd.f32 %v2106_v6, %v2085_v58 }
 0x4d7   :  { %1701 = vmatprep.subr.bf16.mxu0 %v1896_v0 }
 0x4da   :  { %1703 = vmatpush3.bf16.msra.mxu0 %v2015_v15 }
 0x4db   :  { %1704 = vmatprep.subr.bf16.mxu0 %v1896_v0 }
 0x4de   :  { %1706 = vmatpush3.bf16.msra.mxu0 %v2019_v21 }
 0x4df   :  { %1707 = vmatprep.subr.bf16.mxu0 %v1896_v0 }
 0x4e2   :  { %1709 = vmatpush3.bf16.msra.mxu0 %v2023_v28 }
 0x4e3   :  { %1710 = vmatprep.subr.bf16.mxu0 %v1896_v0 }
 0x4e6   :  { %1712 = vmatpush3.bf16.msra.mxu0 %v2027_v34 }
 0x4e7   :  { %1713 = vmatprep.subr.bf16.mxu0 %v1896_v0 }
 0x4ea   :  { %1715 = vmatpush3.bf16.msra.mxu0 %v2031_v40  ;;  %v1726_v40 = vpack.c.bf16 %v852_v39, %v851_v37 }
 0x4eb   :  { %1716 = vmatprep.subr.bf16.mxu0 %v1896_v0 }
 0x4ee   :  { %1718 = vmatpush3.bf16.msra.mxu0 %v2035_v46  ;;  %v1732_v46 = vpack.c.bf16 %v856_v45, %v855_v44 }
 0x4ef   :  { %1719 = vmatprep.subr.bf16.mxu0 %v1896_v0 }
 0x4f2   :  { %1721 = vmatpush3.bf16.msra.mxu0 %v2039_v50 }
 0x5a8   :  { %v690_v15 = vpop.f32.mrb[12].mxu0 }
 0x5a9   :  { %v694_v21 = vadd.f32 %v690_v15, %v225_v9  ;;  %v1392_v28 = vpop.f32.mrb[13].mxu0 }
 0x5ab   :  { %1766 = vtanh.f32 %v694_v21 }
 0x5b5   :  { %v1767_v34 = vpop.eup %1766 }
 0x5b6   :  { %1426 = vmatmul.mubr.f32.vlgmr.msra.gmra.mrb[6].mxu1 %v1767_v34 }
 0x5b7   :  { %1495 = vmatprep.mubr.msk.f32.mxu1 %vm1897_vm0, %v1898_v1  ;;  %1724 = vmatpush3.bf16.msra.mxu1 %v1723_v38  ;;  %v857_v1 = vld [vmem:[#allocation10 + $0x40] sm:$0xff] }
 0x5b8   :  { %1725 = vmatprep.subr.bf16.mxu1 %v1896_v0  ;;  %v1735_v48 = vpack.c.bf16 %v858_v47, %v857_v1 }
 0x5bb   :  { %1727 = vmatpush3.bf16.msra.mxu1 %v1726_v40 }
 0x5bc   :  { %1728 = vmatprep.subr.bf16.mxu1 %v1896_v0 }
 0x5bf   :  { %1730 = vmatpush3.bf16.msra.mxu1 %v1729_v43 }
 0x5c0   :  { %1731 = vmatprep.subr.bf16.mxu1 %v1896_v0 }
 0x5c3   :  { %1733 = vmatpush3.bf16.msra.mxu1 %v1732_v46 }
 0x5c4   :  { %1734 = vmatprep.subr.bf16.mxu1 %v1896_v0 }
 0x5c7   :  { %1736 = vmatpush3.bf16.msra.mxu1 %v1735_v48 }
 0x5c8   :  { %1737 = vmatprep.subr.bf16.mxu1 %v1896_v0 }
 0x5cb   :  { %1739 = vmatpush3.bf16.msra.mxu1 %v1738_v56 }
 0x5cc   :  { %1740 = vmatprep.subr.bf16.mxu1 %v1896_v0 }
 0x5cf   :  { %1742 = vmatpush3.bf16.msra.mxu1 %v1741_v60 }
 0x5d0   :  { %1743 = vmatprep.subr.bf16.mxu1 %v1896_v0 }
 0x5d3   :  { %1745 = vmatpush3.bf16.msra.mxu1 %v1744_v63 }
 0x689   :  { %v764_v50 = vpop.f32.mrb[6].mxu1 }
 0x68a   :  { %v768_v51 = vadd.f32 %v764_v50, %v226_v49  ;;  %v1427_v52 = vpop.f32.mrb[7].mxu1 }
 0x68c   :  { %1768 = vtanh.f32 %v768_v51 }
 0x696   :  { %v1769_v53 = vpop.eup %1768 }
 0x697   :  { %1461 = vmatmul.mubr.f32.vlgmr.msra.gmra.mrb[14].mxu0 %v1769_v53 }
 0x76a   :  { %v838_v3 = vpop.f32.mrb[14].mxu0 }
 0x76b   :  { %v842_v4 = vadd.f32 %v838_v3, %v227_v2  ;;  %v1462_v5 = vpop.f32.mrb[15].mxu0 }
 0x76d   :  { %1770 = vtanh.f32 %v842_v4 }
 0x777   :  { %v1771_v6 = vpop.eup %1770 }
 0x778   :  { %1496 = vmatmul.mubr.f32.vlgmr.msra.gmra.mrb[8].mxu1 %v1771_v6 }
 0x84b   :  { %v938_v10 = vpop.f32.mrb[8].mxu1 }
 0x84c   :  { %v939_v11 = vadd.f32 %v961_v7, %v938_v10  ;;  %v1497_v12 = vpop.f32.mrb[9].mxu1 }
 0x84e   :  { %942 = vst [vmem:[#allocation12] sm:$0xff] %v939_v11 }
 0x84f   :  { %1871 = shalt.err (!%p1868_p8)
}
 0x850   :  { %s1872_s27 = scalar_lea.hbm %s2226_s6, 128 }
 0x851   :  { %p1873_p9 = scmp.ne.s32.totalorder %s2226_s6, %s1872_s27  ;;  %p1876_p10 = scmp.lt.u32.totalorder %s1872_s27, %s2226_s6 }
 0x853   :  { %p1878_p11 = pnand %p1876_p10, %p1873_p9 }
 0x855   :  { %1881 = shalt.err (!%p1878_p11)
}
 0x856   :  { %952 = dma.vmem_to_hbm [thread:$0]  %s950_s22, 128, %s2226_s6, [#allocation6]  }
 0x857   :  { %1888 = dma.done.wait [#allocation6], 128  }
 0x858   :  { %1889 = vsyncadd [#allocation6], 4294967168 }
 0x859   :  { %956 = vsyncpa [#allocation5], 1 }
 0x85a   :  { %957 = vsyncpa [#allocation8], 1 }
 0x85b   :  { %958 = vsyncpa [#allocation11], 1 }
 0x85c   :  { %959 = vsyncpa [#allocation6], 1 }

</bundles_post_ra>
